<compile_context>
chip_gen: v7x
topology: tpu7x:2x2x1
jax: 0.10.0
libtpu: 0.0.40
codegen_flags: <defaults>
</compile_context>

<pallas_src>
import functools

import jax
import jax.numpy as jnp
from jax.experimental import pallas as pl
from jax.experimental.pallas import tpu as pltpu


_LANES = 128


def _round_up(x, m):
    return (x + m - 1) // m * m


def _chunk_and_vmem_limit():
    """Per-generation (max_chunk_rows, vmem_limit_bytes)."""
    try:
        vmem_cap = pltpu.get_tpu_info().vmem_capacity_bytes
    except Exception:
        vmem_cap = None
    if vmem_cap is not None and vmem_cap >= 128 * 1024 * 1024:
        # v5e / v6e: 128 MiB physical VMEM; the default *scoped* limit is the
        # binding constraint, so raise it and use 8192-row (4 MiB) chunks:
        # 4 input streams x 2 pipeline buffers = 32 MiB resident.
        return 8192, 96 * 1024 * 1024
    # v7x (64 MiB VMEM) or unknown generation: the known-good 4096-row /
    # 48 MiB configuration (16 MiB of double-buffered inputs + intermediates).
    return 4096, 48 * 1024 * 1024


def _weighted_mse_kernel(pred_ref, mask_ref, gt_ref, err_ref, num_ref, den_ref,
                         *, alpha, chunk_rows, rows, chunks_per_split,
                         needs_tail_mask):
    """Processes one (1, chunk_rows, 128) tile of one (split, sample)."""
    s = pl.program_id(0)          # row-split index (v7x core balance)
    k = pl.program_id(2)          # chunk index within this split

    # num/den output blocks are resident across the (arbitrary) chunk axis:
    # zero-init on the first chunk of each (split, sample), then accumulate.
    @pl.when(k == 0)
    def _():
        num_ref[...] = jnp.zeros_like(num_ref)
        den_ref[...] = jnp.zeros_like(den_ref)

    o = pred_ref[...].astype(jnp.float32)
    m = mask_ref[...].astype(jnp.float32)
    g = gt_ref[...].astype(jnp.float32)
    e = err_ref[...].astype(jnp.float32)

    diff = (o - g) * m                        # output*mask - gt*mask
    wgt = m * (1.0 + alpha * e)               # mask * (1 + alpha * error)

    if needs_tail_mask:
        # Ragged tail / dead split blocks: rows at-or-beyond `rows` were never
        # DMA'd (undefined data, possibly NaN/Inf); zeroing via the mask input
        # is not enough (NaN*0 = NaN), so force both terms to 0 explicitly.
        row_in_chunk = jax.lax.broadcasted_iota(jnp.int32, diff.shape, 1)
        global_row = (s * chunks_per_split + k) * chunk_rows + row_in_chunk
        valid = global_row < rows
        diff = jnp.where(valid, diff, 0.0)
        wgt = jnp.where(valid, wgt, 0.0)

    num_c = diff * diff * wgt                 # (1, chunk_rows, 128)
    # vreg-shaped partial sums: (chunk_rows,128) -> (chunk_rows//8, 8, 128) is
    # the native (8,128) tile decomposition, so the axis-0 sum is pure VPU
    # adds (no XLU cross-lane reduce in the hot loop).
    num_part = jnp.sum(num_c.reshape(-1, 8, _LANES), axis=0)
    den_part = jnp.sum(wgt.reshape(-1, 8, _LANES), axis=0)
    num_ref[...] = num_ref[...] + num_part[None, None]
    den_ref[...] = den_ref[...] + den_part[None, None]


def weighted_mse_loss(output, mask, ground_truth, error, normalizer=None,
                      alpha_weighted=0.5, max_chunk_rows=None, row_splits=None):
    """Returns (loss, output, ground_truth) exactly like the PyTorch module."""
    del normalizer  # unused in the reference forward pass
    b, c, h, w = output.shape
    n = c * h * w

    # Lane/sublane-dense view: (b, rows, 128) with rows a multiple of 8.
    rows = _round_up(pl.cdiv(n, _LANES), 8)
    n_padded = rows * _LANES

    default_chunk, vmem_limit = _chunk_and_vmem_limit()
    if max_chunk_rows is None:
        max_chunk_rows = default_chunk
    max_chunk_rows = max(8, (max_chunk_rows // 8) * 8)

    if row_splits is None:
        # Keep both v7x TensorCores busy for single-sample batches (harmless
        # on 1-TC parts).
        row_splits = 2 if b == 1 else 1

    if rows <= max_chunk_rows:
        chunk_rows = rows           # single full-extent chunk, no tail
    else:
        chunk_rows = max_chunk_rows
    n_chunks = pl.cdiv(rows, chunk_rows)

    # For b == 1 with a single chunk, carve the rows so both splits get work.
    if row_splits > 1 and n_chunks < row_splits and rows >= 8 * row_splits:
        chunk_rows = _round_up(pl.cdiv(rows, row_splits), 8)
        n_chunks = pl.cdiv(rows, chunk_rows)

    row_splits = max(1, min(row_splits, n_chunks))
    chunks_per_split = pl.cdiv(n_chunks, row_splits)
    needs_tail_mask = (row_splits * chunks_per_split * chunk_rows) != rows
    last_block = n_chunks - 1

    def _prep(x):
        flat = x.reshape(b, n)
        if n_padded != n:
            # Minimal pad (<1024 elems/sample) to the next (8,128) tile; only
            # triggers when C*H*W is not a multiple of 1024.  Zero padding is
            # exact: mask == 0 there, so num and den both get 0.
            flat = jnp.pad(flat, ((0, 0), (0, n_padded - n)))
        return flat.reshape(b, rows, _LANES)

    kernel = functools.partial(
        _weighted_mse_kernel, alpha=alpha_weighted, chunk_rows=chunk_rows,
        rows=rows, chunks_per_split=chunks_per_split,
        needs_tail_mask=needs_tail_mask)

    def in_map(s, i, k):
        # Clamp so the DMA stays in-bounds even for dead tail blocks; the
        # in-kernel validity mask zeroes their contribution.
        return (i, jnp.minimum(s * chunks_per_split + k, last_block), 0)

    in_spec = pl.BlockSpec((1, chunk_rows, _LANES), in_map)
    out_spec = pl.BlockSpec((1, 1, 8, _LANES), lambda s, i, k: (s, i, 0, 0))
    acc_shape = jax.ShapeDtypeStruct((row_splits, b, 8, _LANES), jnp.float32)

    num_p, den_p = pl.pallas_call(
        kernel,
        out_shape=(acc_shape, acc_shape),
        grid_spec=pltpu.PrefetchScalarGridSpec(
            num_scalar_prefetch=0,
            grid=(row_splits, b, chunks_per_split),
            in_specs=[in_spec, in_spec, in_spec, in_spec],
            out_specs=[out_spec, out_spec],
        ),
        compiler_params=pltpu.CompilerParams(
            dimension_semantics=("parallel", "parallel", "arbitrary"),
            vmem_limit_bytes=vmem_limit),
    )(_prep(output), _prep(mask), _prep(ground_truth), _prep(error))

    num = jnp.sum(num_p, axis=(0, 2, 3))
    den = jnp.sum(den_p, axis=(0, 2, 3))
    per_sample_mean = jnp.where(den != 0.0, num / den, 0.0)
    loss = jnp.mean(per_sample_mean)
    return loss, output, ground_truth


def _reference_loss(output, mask, ground_truth, error, alpha):
    # Pure-JAX reference mirroring the PyTorch math (no Pallas).
    o = output.astype(jnp.float32)
    m = mask.astype(jnp.float32)
    g = ground_truth.astype(jnp.float32)
    e = error.astype(jnp.float32)
    diff = (o - g) * m
    wgt = m * (1.0 + alpha * e)
    num = jnp.sum(diff * diff * wgt, axis=(1, 2, 3))
    den = jnp.sum(wgt, axis=(1, 2, 3))
    per = jnp.where(den != 0.0, num / den, 0.0)
    return jnp.mean(per)


if __name__ == "__main__":
    key = jax.random.PRNGKey(0)
    k1, k2, k3, k4 = jax.random.split(key, 4)

    # --- case 1: NCHW shapes implied by the PyTorch module (no padding) ---
    b, c, h, w = 2, 4, 16, 16
    output = jax.random.normal(k1, (b, c, h, w), dtype=jnp.float32)
    ground_truth = jax.random.normal(k2, (b, c, h, w), dtype=jnp.float32)
    error = jnp.abs(jax.random.normal(k3, (b, c, h, w), dtype=jnp.float32))
    normalizer = jnp.ones((b,), dtype=jnp.float32)  # unused by the forward

    # Binary mask; channels 2 and 3 fully zero (exercises the channel
    # "selection" path of the PyTorch module, which is a no-op here).
    pix_mask = (jax.random.uniform(k4, (b, c, h, w)) > 0.5).astype(jnp.float32)
    chan_active = jnp.array([1.0, 1.0, 0.0, 0.0]).reshape(1, c, 1, 1)
    mask = pix_mask * chan_active

    loss, out_ret, gt_ret = weighted_mse_loss(
        output, mask, ground_truth, error, normalizer, alpha_weighted=0.5)
    jax.block_until_ready(loss)
    ref = _reference_loss(output, mask, ground_truth, error, alpha=0.5)
    assert jnp.allclose(loss, ref, rtol=1e-5, atol=1e-6), (loss, ref)
    assert out_ret is output and gt_ret is ground_truth

    # --- case 1b: bf16 inputs (halved HBM traffic), f32 accumulation ---
    out_bf = output.astype(jnp.bfloat16)
    gt_bf = ground_truth.astype(jnp.bfloat16)
    err_bf = error.astype(jnp.bfloat16)
    mask_bf = mask.astype(jnp.bfloat16)
    loss_bf, _, _ = weighted_mse_loss(out_bf, mask_bf, gt_bf, err_bf, None,
                                      alpha_weighted=0.5)
    jax.block_until_ready(loss_bf)
    ref_bf = _reference_loss(out_bf, mask_bf, gt_bf, err_bf, alpha=0.5)
    assert jnp.allclose(loss_bf, ref_bf, rtol=1e-4, atol=1e-5), (loss_bf, ref_bf)

    # --- case 2: lane-pad (n not a multiple of 128) + multi-chunk accumulation
    b2, c2, h2, w2 = 2, 3, 20, 24   # n = 1440 -> padded to 2048, 2 chunks of 8 rows
    ka, kb, kc, kd = jax.random.split(jax.random.PRNGKey(1), 4)
    out2 = jax.random.normal(ka, (b2, c2, h2, w2), dtype=jnp.float32)
    gt2 = jax.random.normal(kb, (b2, c2, h2, w2), dtype=jnp.float32)
    err2 = jnp.abs(jax.random.normal(kc, (b2, c2, h2, w2), dtype=jnp.float32))
    mask2 = (jax.random.uniform(kd, (b2, c2, h2, w2)) > 0.3).astype(jnp.float32)
    loss2, _, _ = weighted_mse_loss(out2, mask2, gt2, err2, None,
                                    alpha_weighted=0.5, max_chunk_rows=8)
    jax.block_until_ready(loss2)
    ref2 = _reference_loss(out2, mask2, gt2, err2, alpha=0.5)
    assert jnp.allclose(loss2, ref2, rtol=1e-5, atol=1e-6), (loss2, ref2)

    # --- case 3: b == 1 -> row_splits=2, ragged tail handled by iota mask ---
    b3, c3, h3, w3 = 1, 3, 32, 32   # n = 3072, rows = 24, no padding
    ke, kf, kg, kh = jax.random.split(jax.random.PRNGKey(2), 4)
    out3 = jax.random.normal(ke, (b3, c3, h3, w3), dtype=jnp.float32)
    gt3 = jax.random.normal(kf, (b3, c3, h3, w3), dtype=jnp.float32)
    err3 = jnp.abs(jax.random.normal(kg, (b3, c3, h3, w3), dtype=jnp.float32))
    mask3 = (jax.random.uniform(kh, (b3, c3, h3, w3)) > 0.4).astype(jnp.float32)
    # chunk=16 -> 2 chunks (second partial), split across both "cores"
    loss3, _, _ = weighted_mse_loss(out3, mask3, gt3, err3, None,
                                    alpha_weighted=0.5, max_chunk_rows=16)
    jax.block_until_ready(loss3)
    ref3 = _reference_loss(out3, mask3, gt3, err3, alpha=0.5)
    assert jnp.allclose(loss3, ref3, rtol=1e-5, atol=1e-6), (loss3, ref3)

    # --- case 4: same tensors, chunk=8 -> 3 chunks over 2 splits: one fully
    # dead (clamped + masked) block is exercised ---
    loss4, _, _ = weighted_mse_loss(out3, mask3, gt3, err3, None,
                                    alpha_weighted=0.5, max_chunk_rows=8)
    jax.block_until_ready(loss4)
    assert jnp.allclose(loss4, ref3, rtol=1e-5, atol=1e-6), (loss4, ref3)

    print("KERNEL_OK")
</pallas_src>

<mosaic_0001>
module attributes {stable_mosaic.version = 11 : i64} {
  func.func @_weighted_mse_kernel(%arg0: i32, %arg1: i32, %arg2: i32, %arg3: memref<1x8x128xf32, #tpu.memory_space<vmem>>, %arg4: memref<1x8x128xf32, #tpu.memory_space<vmem>>, %arg5: memref<1x8x128xf32, #tpu.memory_space<vmem>>, %arg6: memref<1x8x128xf32, #tpu.memory_space<vmem>>, %arg7: memref<1x1x8x128xf32, #tpu.memory_space<vmem>>, %arg8: memref<1x1x8x128xf32, #tpu.memory_space<vmem>>) attributes {dimension_semantics = [#tpu.dimension_semantics<parallel>, #tpu.dimension_semantics<parallel>, #tpu.dimension_semantics<arbitrary>], iteration_bounds = array<i64: 1, 2, 1>, scalar_prefetch = 0 : i64, scratch_operands = 0 : i64, tpu.core_type = #tpu.core_type<tc>, window_params = [{transform_indices = @transform_0, window_bounds = array<i64: 1, 8, 128>}, {transform_indices = @transform_1, window_bounds = array<i64: 1, 8, 128>}, {transform_indices = @transform_2, window_bounds = array<i64: 1, 8, 128>}, {transform_indices = @transform_3, window_bounds = array<i64: 1, 8, 128>}, {transform_indices = @transform_4, window_bounds = array<i64: 1, 1, 8, 128>}, {transform_indices = @transform_5, window_bounds = array<i64: 1, 1, 8, 128>}]} {
    %c0_i32 = arith.constant 0 : i32
    %0 = arith.cmpi eq, %arg2, %c0_i32 : i32
    %1 = arith.extui %0 : i1 to i32
    %c0_i32_0 = arith.constant 0 : i32
    %2 = arith.cmpi ne, %1, %c0_i32_0 : i32
    scf.if %2 {
      %cst_31 = arith.constant 0.000000e+00 : f32
      %26 = vector.broadcast %cst_31 : f32 to vector<1x1x8x128xf32>
      %c0_32 = arith.constant 0 : index
      %c0_33 = arith.constant 0 : index
      %c0_34 = arith.constant 0 : index
      %c0_35 = arith.constant 0 : index
      %27 = vector.load %arg7[%c0_32, %c0_33, %c0_34, %c0_35] : memref<1x1x8x128xf32, #tpu.memory_space<vmem>>, vector<1x1x8x128xf32>
      tpu.vector_store %arg7[%c0_32, %c0_33, %c0_34, %c0_35], %26 {strides = array<i32>} : memref<1x1x8x128xf32, #tpu.memory_space<vmem>>, vector<1x1x8x128xf32>,
      %cst_36 = arith.constant 0.000000e+00 : f32
      %28 = vector.broadcast %cst_36 : f32 to vector<1x1x8x128xf32>
      %c0_37 = arith.constant 0 : index
      %c0_38 = arith.constant 0 : index
      %c0_39 = arith.constant 0 : index
      %c0_40 = arith.constant 0 : index
      %29 = vector.load %arg8[%c0_37, %c0_38, %c0_39, %c0_40] : memref<1x1x8x128xf32, #tpu.memory_space<vmem>>, vector<1x1x8x128xf32>
      tpu.vector_store %arg8[%c0_37, %c0_38, %c0_39, %c0_40], %28 {strides = array<i32>} : memref<1x1x8x128xf32, #tpu.memory_space<vmem>>, vector<1x1x8x128xf32>,
    } else {
    }
    %c0 = arith.constant 0 : index
    %c0_1 = arith.constant 0 : index
    %c0_2 = arith.constant 0 : index
    %3 = vector.load %arg3[%c0, %c0_1, %c0_2] : memref<1x8x128xf32, #tpu.memory_space<vmem>>, vector<1x8x128xf32>
    %c0_3 = arith.constant 0 : index
    %c0_4 = arith.constant 0 : index
    %c0_5 = arith.constant 0 : index
    %4 = vector.load %arg4[%c0_3, %c0_4, %c0_5] : memref<1x8x128xf32, #tpu.memory_space<vmem>>, vector<1x8x128xf32>
    %c0_6 = arith.constant 0 : index
    %c0_7 = arith.constant 0 : index
    %c0_8 = arith.constant 0 : index
    %5 = vector.load %arg5[%c0_6, %c0_7, %c0_8] : memref<1x8x128xf32, #tpu.memory_space<vmem>>, vector<1x8x128xf32>
    %c0_9 = arith.constant 0 : index
    %c0_10 = arith.constant 0 : index
    %c0_11 = arith.constant 0 : index
    %6 = vector.load %arg6[%c0_9, %c0_10, %c0_11] : memref<1x8x128xf32, #tpu.memory_space<vmem>>, vector<1x8x128xf32>
    %7 = arith.subf %3, %5 : vector<1x8x128xf32>
    %8 = arith.mulf %7, %4 : vector<1x8x128xf32>
    %cst = arith.constant 5.000000e-01 : f32
    %9 = vector.broadcast %cst : f32 to vector<1x8x128xf32>
    %10 = arith.mulf %9, %6 : vector<1x8x128xf32>
    %cst_12 = arith.constant 1.000000e+00 : f32
    %11 = vector.broadcast %cst_12 : f32 to vector<1x8x128xf32>
    %12 = arith.addf %11, %10 : vector<1x8x128xf32>
    %13 = arith.mulf %4, %12 : vector<1x8x128xf32>
    %14 = arith.mulf %8, %8 : vector<1x8x128xf32>
    %15 = arith.mulf %14, %13 : vector<1x8x128xf32>
    %cst_13 = arith.constant dense<0.000000e+00> : vector<8x128xf32>
    %16 = vector.multi_reduction <add>, %15, %cst_13 [0] : vector<1x8x128xf32> to vector<8x128xf32>
    %cst_14 = arith.constant dense<0.000000e+00> : vector<8x128xf32>
    %17 = vector.multi_reduction <add>, %13, %cst_14 [0] : vector<1x8x128xf32> to vector<8x128xf32>
    %c0_15 = arith.constant 0 : index
    %c0_16 = arith.constant 0 : index
    %c0_17 = arith.constant 0 : index
    %c0_18 = arith.constant 0 : index
    %18 = vector.load %arg7[%c0_15, %c0_16, %c0_17, %c0_18] : memref<1x1x8x128xf32, #tpu.memory_space<vmem>>, vector<1x1x8x128xf32>
    %19 = vector.shape_cast %16 : vector<8x128xf32> to vector<1x1x8x128xf32>
    %20 = arith.addf %18, %19 : vector<1x1x8x128xf32>
    %c0_19 = arith.constant 0 : index
    %c0_20 = arith.constant 0 : index
    %c0_21 = arith.constant 0 : index
    %c0_22 = arith.constant 0 : index
    %21 = vector.load %arg7[%c0_19, %c0_20, %c0_21, %c0_22] : memref<1x1x8x128xf32, #tpu.memory_space<vmem>>, vector<1x1x8x128xf32>
    tpu.vector_store %arg7[%c0_19, %c0_20, %c0_21, %c0_22], %20 {strides = array<i32>} : memref<1x1x8x128xf32, #tpu.memory_space<vmem>>, vector<1x1x8x128xf32>,
    %c0_23 = arith.constant 0 : index
    %c0_24 = arith.constant 0 : index
    %c0_25 = arith.constant 0 : index
    %c0_26 = arith.constant 0 : index
    %22 = vector.load %arg8[%c0_23, %c0_24, %c0_25, %c0_26] : memref<1x1x8x128xf32, #tpu.memory_space<vmem>>, vector<1x1x8x128xf32>
    %23 = vector.shape_cast %17 : vector<8x128xf32> to vector<1x1x8x128xf32>
    %24 = arith.addf %22, %23 : vector<1x1x8x128xf32>
    %c0_27 = arith.constant 0 : index
    %c0_28 = arith.constant 0 : index
    %c0_29 = arith.constant 0 : index
    %c0_30 = arith.constant 0 : index
    %25 = vector.load %arg8[%c0_27, %c0_28, %c0_29, %c0_30] : memref<1x1x8x128xf32, #tpu.memory_space<vmem>>, vector<1x1x8x128xf32>
    tpu.vector_store %arg8[%c0_27, %c0_28, %c0_29, %c0_30], %24 {strides = array<i32>} : memref<1x1x8x128xf32, #tpu.memory_space<vmem>>, vector<1x1x8x128xf32>,
    return
  }
  func.func @transform_0(%arg0: i32, %arg1: i32, %arg2: i32) -> (i32, i32, i32) {
    %c1_i32 = arith.constant 1 : i32
    %0 = arith.muli %arg0, %c1_i32 : i32
    %1 = arith.addi %0, %arg2 : i32
    %c0_i32 = arith.constant 0 : i32
    %2 = arith.minsi %1, %c0_i32 : i32
    %c0_i32_0 = arith.constant 0 : i32
    %c0_i32_1 = arith.constant 0 : i32
    return %arg1, %2, %c0_i32_0 : i32, i32, i32
  }
  func.func @transform_1(%arg0: i32, %arg1: i32, %arg2: i32) -> (i32, i32, i32) {
    %c1_i32 = arith.constant 1 : i32
    %0 = arith.muli %arg0, %c1_i32 : i32
    %1 = arith.addi %0, %arg2 : i32
    %c0_i32 = arith.constant 0 : i32
    %2 = arith.minsi %1, %c0_i32 : i32
    %c0_i32_0 = arith.constant 0 : i32
    %c0_i32_1 = arith.constant 0 : i32
    return %arg1, %2, %c0_i32_0 : i32, i32, i32
  }
  func.func @transform_2(%arg0: i32, %arg1: i32, %arg2: i32) -> (i32, i32, i32) {
    %c1_i32 = arith.constant 1 : i32
    %0 = arith.muli %arg0, %c1_i32 : i32
    %1 = arith.addi %0, %arg2 : i32
    %c0_i32 = arith.constant 0 : i32
    %2 = arith.minsi %1, %c0_i32 : i32
    %c0_i32_0 = arith.constant 0 : i32
    %c0_i32_1 = arith.constant 0 : i32
    return %arg1, %2, %c0_i32_0 : i32, i32, i32
  }
  func.func @transform_3(%arg0: i32, %arg1: i32, %arg2: i32) -> (i32, i32, i32) {
    %c1_i32 = arith.constant 1 : i32
    %0 = arith.muli %arg0, %c1_i32 : i32
    %1 = arith.addi %0, %arg2 : i32
    %c0_i32 = arith.constant 0 : i32
    %2 = arith.minsi %1, %c0_i32 : i32
    %c0_i32_0 = arith.constant 0 : i32
    %c0_i32_1 = arith.constant 0 : i32
    return %arg1, %2, %c0_i32_0 : i32, i32, i32
  }
  func.func @transform_4(%arg0: i32, %arg1: i32, %arg2: i32) -> (i32, i32, i32, i32) {
    %c0_i32 = arith.constant 0 : i32
    %c0_i32_0 = arith.constant 0 : i32
    %c0_i32_1 = arith.constant 0 : i32
    return %arg0, %arg1, %c0_i32, %c0_i32_0 : i32, i32, i32, i32
  }
  func.func @transform_5(%arg0: i32, %arg1: i32, %arg2: i32) -> (i32, i32, i32, i32) {
    %c0_i32 = arith.constant 0 : i32
    %c0_i32_0 = arith.constant 0 : i32
    %c0_i32_1 = arith.constant 0 : i32
    return %arg0, %arg1, %c0_i32, %c0_i32_0 : i32, i32, i32, i32
  }
}

</mosaic_0001>

<bundles_post_ra>
// kernel: tpu_custom_call.1
= control target key start
LH: loop header
LB: loop body
LE: loop exit
PB: predicated region body
PF: predicated region fallthrough
CT: control target
= control target key end

     0   :  { %s1407_s0 = inlined_call_operand.hbm [shape: f32[2,8,128], index: 0, kind: input, shape index: {}]   ;;  %s1408_s1 = inlined_call_operand.hbm [shape: f32[2,8,128], index: 1, kind: input, shape index: {}]   ;;  %s1409_s2 = inlined_call_operand.hbm [shape: f32[2,8,128], index: 2, kind: input, shape index: {}]   ;;  %s1410_s3 = inlined_call_operand.hbm [shape: f32[2,8,128], index: 3, kind: input, shape index: {}]   ;;  %s1411_s4 = inlined_call_operand.hbm [shape: f32[1,2,8,128], index: 4, kind: output, shape index: {0}]   ;;  %s1412_s5 = inlined_call_operand.hbm [shape: f32[1,2,8,128], index: 5, kind: output, shape index: {1}]  }
   0x1   :  { %1423 = sst [smem:[#allocation24_spill]] %s1408_s1 }
   0x2   :  { %11 = vsyncpa [#allocation3], 0 }
   0x3   :  { %13 = vsyncpa [#allocation3 + $0x1], 0 }
   0x4   :  { %14 = vsyncpa [#allocation6], 0 }
   0x5   :  { %16 = vsyncpa [#allocation6 + $0x1], 0 }
   0x6   :  { %17 = vsyncpa [#allocation9], 0 }
   0x7   :  { %19 = vsyncpa [#allocation9 + $0x1], 0 }
   0x8   :  { %20 = vsyncpa [#allocation4], 0 }
   0x9   :  { %22 = vsyncpa [#allocation4 + $0x1], 0 }
   0xa   :  { %23 = vsyncpa [#allocation12], 0 }
   0xb   :  { %25 = vsyncpa [#allocation12 + $0x1], 0  ;;  %s1078_s18 = smov 0   ;;  %s1080_s19 = smov 0  }
   0xc   :  { %s1082_s20 = smov 0   ;;  %s1084_s21 = smov 0  }
   0xd   :  { %s1086_s22 = smov 0   ;;  %s1088_s23 = smov 0  }
   0xe LB: > { %1424 = sst [smem:[#allocation18_spill]] %s1028_s20  ;;  %s1109_s24 = sadd.s32 4294967295, %s1040_s23   ;;  %s1040_s23 = sphi %s1088_s23, %s31_s23   ;;  %s1036_s22 = sphi %s1086_s22, %s1452_s22   ;;  %s1032_s21 = sphi %s1084_s21, %s1451_s21   ;;  %s1028_s20 = sphi %s1082_s20, %s1450_s20   ;;  %s1024_s19 = sphi %s1080_s19, %s1454_s19   ;;  %s1020_s18 = sphi %s1078_s18, %s1453_s18  }
   0xf   : > { %1425 = sst [smem:[#allocation19_spill]] %s1036_s22  ;;  %s691_s25 = sadd.s32 4294967294, %s1040_s23  }
  0x10   : > { %1426 = sst [smem:[#allocation20_spill]] %s1040_s23  ;;  %s46_s26 = sadd.s32 1, %s1036_s22 }
  0x11   : > { %s65_s27 = sadd.s32 1, %s1028_s20  ;;  %p48_p0 = scmp.ge.s32.totalorder %s46_s26, 2 }
  0x12   : > { %p72_p1 = scmp.ne.s32.totalorder %s1028_s20, %s1024_s19  ;;  %p73_p2 = scmp.eq.s32.totalorder %s1040_s23, 0 }
  0x13   : > { %p78_p3 = scmp.ne.s32.totalorder %s1024_s19, %s1020_s18  ;;  %s1456_s26 = smov (%p48_p0, %s46_s26), 0 }
  0x14   : > { %1427 = sst [smem:[#allocation21_spill]] %s1456_s26  ;;  %p1121_p4 = por %p73_p2, %p72_p1 }
  0x15   : > { %p79_p5 = scmp.eq.s32.totalorder %s1109_s24, 0  ;;  %s60_s29 = ssub.s32 %s1036_s22, %s1456_s26 }
  0x16   : > { %p206_p6 = scmp.eq.s32.totalorder %s1109_s24, 1  ;;  %p63_p7 = scmp.eq.s32.totalorder %s60_s29, 0 }
  0x17   : > { %p1129_p8 = por %p79_p5, %p78_p3  ;;  %p212_p10 = scmp.eq.s32.totalorder %s691_s25, 1 }
  0x18   : > { %p1133_p9 = por %p206_p6, %p72_p1  ;;  %p747_p13 = scmp.lt.s32.totalorder %s1040_s23, 2 }
  0x19   : > { %s1429_s30 = scalar_select %p1129_p8, 1, 0 }
  0x1a   : > { %s1430_s6 = scalar_select %p1133_p9, 1, 0 }
  0x1b   : > { %s1138_s7 = scalar_select %p63_p7, %s1028_s20, %s65_s27  }
  0x1c   : > { %p1140_p11 = por %p212_p10, %p78_p3  ;;  %s1147_s9 = sand.u32 1, %s1028_s20  }
  0x1d   : > { %1431 = sst [smem:[#allocation22_spill]] %s1138_s7  ;;  %s1150_s10 = sshll.u32 %s1147_s9, 3 }
  0x1e   : > { %s1432_s8 = scalar_select %p1140_p11, 1, 0 }
  0x1f   : > { %s1153_s11 = sshll.u32 %s1036_s22, 7  ;;  %p1157_p0 = pnand %p747_p13, %p1121_p4 }
  0x20   : > { %1433 = sst [smem:[#allocation23_spill]] %s1432_s8  ;;  %s282_s13 = sand.u32 1, %s1040_s23  }
  0x21   : > { %s1434_s12 = scalar_select %p1157_p0, 1, 0 }
  0x22   : > { %s1435_s1 = sld [smem:[#allocation24_spill]]  ;;  %s286_s17 = scalar_lea.vmem [#allocation5], %s1150_s10 }
  0x23   : > { %s297_s25 = sshll.u32 %s286_s17, 4  ;;  %s1173_s27 = scalar_lea.sflag [#allocation6], %s282_s13  ;;  %s1170_s25 = int_to_ptr.vmem [resolvable:$true] %s297_s25 }
  0x24   : > { %p1179_p4 = pneg %p1157_p0 }
  0x28   : > { %s1166_s16 = scalar_lea.hbm %s1435_s1, %s1153_s11  ;;  %s803_s17 = scalar_lea.hbm %s1435_s1, 256 }
  0x29   : > { %s798_s28 = scalar_lea.hbm %s1166_s16, 128  ;;  %p804_p7 = scmp.lt.u32.totalorder %s1166_s16, %s1435_s1 }
  0x2a   : > { %p799_p3 = scmp.ne.s32.totalorder %s1166_s16, %s798_s28  ;;  %p805_p10 = scmp.lt.u32.totalorder %s803_s17, %s798_s28 }
  0x2b   : > { %p807_p12 = scmp.lt.u32.totalorder %s798_s28, %s1166_s16 }
  0x2c   : > { %p801_p5 = pnand %p1179_p4, %p799_p3  ;;  %p806_p13 = por %p805_p10, %p804_p7 }
  0x2e   : > { %p802_p6 = pneg %p801_p5  ;;  %p808_p1 = por %p807_p12, %p806_p13 }
  0x30   : > { %p809_p2 = pnand %p808_p1, %p802_p6 }
  0x32   : > { %812 = shalt.err (!%p809_p2)
}
  0x33   : > { %s813_s13 = scalar_lea.vmem %s1170_s25, 128  ;;  %s1042_s14 = smov [#allocation5]  }
  0x34   : > { %p814_p3 = scmp.ne.s32.totalorder %s1170_s25, %s813_s13  ;;  %s818_s15 = sshll.u32 %s1042_s14, 4  ;;  %s819_s15 = int_to_ptr.vmem [resolvable:$false] %s818_s15 }
  0x35   : > { %s820_s22 = scalar_lea.vmem %s819_s15, 256  ;;  %p821_p9 = scmp.lt.s32.totalorder %s1170_s25, %s819_s15 }
  0x36   : > { %p816_p5 = pnand %p814_p3, %p1179_p4  ;;  %p822_p8 = scmp.lt.s32.totalorder %s820_s22, %s813_s13 }
  0x38   : > { %p817_p11 = pneg %p816_p5  ;;  %p823_p7 = por %p822_p8, %p821_p9 }
  0x3a   : > { %p824_p10 = pnand %p823_p7, %p817_p11 }
  0x3c   : > { %827 = shalt.err (!%p824_p10)
}
  0x3d   : > { %733 = dma.hbm_to_vmem [thread:$0]  (!%p1157_p0), %s1166_s16, 128, %s1170_s25, %s1173_s27  }
  0x3e   : > { %p1437_p12 = scmp.lt.s32.totalorder %s1040_s23, 3  ;;  %p1438_p1 = scmp.ge.s32.totalorder %s1040_s23, 1 }
  0x3f   : > { %s1215_s13 = scalar_lea.hbm %s1407_s0, %s1153_s11  ;;  %s264_s14 = scalar_lea.vmem [#allocation2], %s1150_s10 }
  0x40   : > { %p1207_p2 = pnand %p1438_p1, %p1437_p12  ;;  %s275_s15 = sshll.u32 %s264_s14, 4  ;;  %s1218_s15 = int_to_ptr.vmem [resolvable:$true] %s275_s15 }
  0x41   : > { %s1224_s22 = scalar_lea.hbm %s1409_s2, %s1153_s11  ;;  %s261_s1 = scalar_lea.sflag [#allocation3], %s1147_s9 }
  0x42   : > { %s1439_s26 = scalar_select %p1207_p2, 1, 0 }
  0x43   : > { %s828_s7 = scalar_lea.hbm %s1215_s13, 128  ;;  %s833_s20 = scalar_lea.hbm %s1407_s0, 256 }
  0x44   : > { %p829_p8 = scmp.ne.s32.totalorder %s1215_s13, %s828_s7  ;;  %p834_p6 = scmp.lt.u32.totalorder %s1215_s13, %s1407_s0 }
  0x45   : > { %p835_p13 = scmp.lt.u32.totalorder %s833_s20, %s828_s7  ;;  %p837_p5 = scmp.lt.u32.totalorder %s828_s7, %s1215_s13 }
  0x46   : > { %p831_p9 = pnand %p829_p8, %p1179_p4 }
  0x47   : > { %p836_p3 = por %p835_p13, %p834_p6 }
  0x48   : > { %p832_p11 = pneg %p831_p9 }
  0x49   : > { %p838_p7 = por %p837_p5, %p836_p3 }
  0x4b   : > { %p839_p10 = pnand %p838_p7, %p832_p11 }
  0x4d   : > { %842 = shalt.err (!%p839_p10)
}
  0x4e   : > { %s843_s14 = scalar_lea.vmem %s1218_s15, 128  ;;  %s1043_s16 = smov [#allocation2]  }
  0x4f   : > { %p844_p12 = scmp.ne.s32.totalorder %s1218_s15, %s843_s14  ;;  %s848_s25 = sshll.u32 %s1043_s16, 4  ;;  %s849_s25 = int_to_ptr.vmem [resolvable:$false] %s848_s25 }
  0x50   : > { %s850_s23 = scalar_lea.vmem %s849_s25, 256  ;;  %p851_p9 = scmp.lt.s32.totalorder %s1218_s15, %s849_s25 }
  0x51   : > { %p846_p1 = pnand %p844_p12, %p1179_p4  ;;  %p852_p2 = scmp.lt.s32.totalorder %s850_s23, %s843_s14 }
  0x53   : > { %p847_p8 = pneg %p846_p1  ;;  %p853_p6 = por %p852_p2, %p851_p9 }
  0x55   : > { %p854_p13 = pnand %p853_p6, %p847_p8 }
  0x57   : > { %857 = shalt.err (!%p854_p13)
}
  0x58   : > { %730 = dma.hbm_to_vmem [thread:$0]  (!%p1157_p0), %s1215_s13, 128, %s1218_s15, %s261_s1  }
  0x59   : > { %s308_s20 = scalar_lea.vmem [#allocation7], %s1150_s10  ;;  %s858_s8 = scalar_lea.hbm %s1224_s22, 128 }
  0x5a   : > { %s319_s7 = sshll.u32 %s308_s20, 4  ;;  %p859_p11 = scmp.ne.s32.totalorder %s1224_s22, %s858_s8  ;;  %s320_s7 = int_to_ptr.vmem [resolvable:$true] %s319_s7 }
  0x5b   : > { %s863_s14 = scalar_lea.hbm %s1409_s2, 256  ;;  %p864_p5 = scmp.lt.u32.totalorder %s1224_s22, %s1409_s2 }
  0x5c   : > { %p861_p2 = pnand %p859_p11, %p1179_p4  ;;  %p865_p7 = scmp.lt.u32.totalorder %s863_s14, %s858_s8 }
  0x5d   : > { %p867_p12 = scmp.lt.u32.totalorder %s858_s8, %s1224_s22 }
  0x5e   : > { %p862_p3 = pneg %p861_p2  ;;  %p866_p10 = por %p865_p7, %p864_p5 }
  0x60   : > { %p868_p1 = por %p867_p12, %p866_p10 }
  0x62   : > { %p869_p8 = pnand %p868_p1, %p862_p3 }
  0x64   : > { %872 = shalt.err (!%p869_p8)
}
  0x65   : > { %s873_s1 = scalar_lea.vmem %s320_s7, 128  ;;  %s1044_s13 = smov [#allocation7]  }
  0x66   : > { %p874_p9 = scmp.ne.s32.totalorder %s320_s7, %s873_s1  ;;  %s878_s15 = sshll.u32 %s1044_s13, 4  ;;  %s879_s15 = int_to_ptr.vmem [resolvable:$false] %s878_s15 }
  0x67   : > { %s880_s23 = scalar_lea.vmem %s879_s15, 256  ;;  %p881_p11 = scmp.lt.s32.totalorder %s320_s7, %s879_s15 }
  0x68   : > { %p876_p6 = pnand %p874_p9, %p1179_p4  ;;  %p882_p2 = scmp.lt.s32.totalorder %s880_s23, %s873_s1 }
  0x6a   : > { %p877_p13 = pneg %p876_p6  ;;  %p883_p0 = por %p882_p2, %p881_p11 }
  0x6c   : > { %p884_p5 = pnand %p883_p0, %p877_p13 }
  0x6e   : > { %887 = shalt.err (!%p884_p5)
}
  0x6f   : > { %p1440_p7 = scmp.ne.s32.totalorder %s1434_s12, 0  ;;  %s1271_s28 = scalar_lea.hbm %s1410_s3, %s1153_s11 }
  0x70   : > { %s330_s17 = scalar_lea.vmem [#allocation8], %s1150_s10  ;;  %s327_s16 = scalar_lea.sflag [#allocation9], %s1147_s9 }
  0x71   : > { %736 = dma.hbm_to_vmem [thread:$0]  (!%p1440_p7), %s1224_s22, 128, %s320_s7, %s1173_s27  }
  0x72   : > { %s341_s14 = sshll.u32 %s330_s17, 4  ;;  %s888_s25 = scalar_lea.hbm %s1271_s28, 128  ;;  %s342_s14 = int_to_ptr.vmem [resolvable:$true] %s341_s14 }
  0x73   : > { %p889_p0 = scmp.ne.s32.totalorder %s1271_s28, %s888_s25  ;;  %s893_s22 = scalar_lea.hbm %s1410_s3, 256 }
  0x74   : > { %p894_p12 = scmp.lt.u32.totalorder %s1271_s28, %s1410_s3  ;;  %p895_p1 = scmp.lt.u32.totalorder %s893_s22, %s888_s25 }
  0x75   : > { %p891_p3 = pnand %p889_p0, %p1179_p4  ;;  %p897_p9 = scmp.lt.u32.totalorder %s888_s25, %s1271_s28 }
  0x76   : > { %p896_p8 = por %p895_p1, %p894_p12 }
  0x77   : > { %p892_p10 = pneg %p891_p3 }
  0x78   : > { %p898_p6 = por %p897_p9, %p896_p8 }
  0x7a   : > { %p899_p13 = pnand %p898_p6, %p892_p10 }
  0x7c   : > { %902 = shalt.err (!%p899_p13)
}
  0x7d   : > { %s903_s9 = scalar_lea.vmem %s342_s14, 128  ;;  %s1045_s10 = smov [#allocation8]  }
  0x7e   : > { %p904_p11 = scmp.ne.s32.totalorder %s342_s14, %s903_s9  ;;  %s908_s13 = sshll.u32 %s1045_s10, 4  ;;  %s909_s13 = int_to_ptr.vmem [resolvable:$false] %s908_s13 }
  0x7f   : > { %s910_s15 = scalar_lea.vmem %s909_s13, 256  ;;  %p911_p0 = scmp.lt.s32.totalorder %s342_s14, %s909_s13 }
  0x80   : > { %p906_p2 = pnand %p904_p11, %p1179_p4  ;;  %p912_p3 = scmp.lt.s32.totalorder %s910_s15, %s903_s9 }
  0x82   : > { %p907_p5 = pneg %p906_p2  ;;  %p913_p7 = por %p912_p3, %p911_p0 }
  0x84   : > { %p914_p1 = pnand %p913_p7, %p907_p5 }
  0x86   : > { %917 = shalt.err (!%p914_p1)
}
  0x87   : > { %p1441_p12 = scmp.ne.s32.totalorder %s1434_s12, 0  ;;  %p1442_p10 = scmp.ne.s32.totalorder %s1439_s26, 0 }
  0x88   : > { %s1295_s29 = sand.u32 (!%p1442_p10), 1, %s1024_s19   ;;  %p1443_p4 = scmp.ne.s32.totalorder (!%p1442_p10), %s1429_s30, 0 }
  0x89   : > { %739 = dma.hbm_to_vmem [thread:$0]  (!%p1441_p12), %s1271_s28, 128, %s342_s14, %s327_s16  }
  0x8a   : > { %350 = sbr.rel (%p1442_p10) target bundleno = 202 (0xca), region = 36  ;;  %s1298_s23 = sshll.u32 (!%p1442_p10), %s1295_s29, 3 }
  0x8b   : > { %s353_s20 = scalar_lea.sflag (!%p1442_p10), [#allocation3], %s1295_s29  ;;  %s356_s8 = scalar_lea.vmem (!%p1442_p10), [#allocation2], %s1298_s23 }
  0x91   : > { %999 = dma.done.wait (%p1443_p4), %s353_s20, 128  }
  0x92   : > { %1001 = vsyncadd (%p1443_p4), %s353_s20, 4294967168  ;;  %s361_s12 = sand.u32 1, %s1109_s24   ;;  %s365_s28 = scalar_lea.vmem [#allocation5], %s1298_s23 }
  0x93   : > { %s362_s26 = scalar_lea.sflag [#allocation6], %s361_s12 }
  0x94   : > { %1003 = dma.done.wait (%p1443_p4), %s362_s26, 256  }
  0x95   : > { %1005 = vsyncadd (%p1443_p4), %s362_s26, 4294967040  ;;  %s374_s17 = scalar_lea.vmem [#allocation7], %s1298_s23  ;;  %s380_s14 = scalar_lea.sflag [#allocation9], %s1295_s29 }
  0x96   : > { %s383_s16 = scalar_lea.vmem [#allocation8], %s1298_s23 }
  0x97   : > { %1007 = dma.done.wait (%p1443_p4), %s380_s14, 128  }
  0x98   : > { %1009 = vsyncadd (%p1443_p4), %s380_s14, 4294967168  ;;  %v448_v0 = vld [vmem:[%s356_s8] sm:$0xff]  ;;  %v449_v1 = vld [vmem:[%s365_s28] sm:$0xff]  ;;  %s711_s24 = sshll.u32 %s1032_s21, 7  ;;  %s429_s25 = scalar_lea.vmem [#allocation11], %s1298_s23 }
  0x99   : > { %v450_v2 = vld [vmem:[%s374_s17] sm:$0xff]  ;;  %v451_v3 = vld [vmem:[%s383_s16] sm:$0xff]  ;;  %s503_s1 = sshll.u32 %s429_s25, 4  ;;  %s422_s30 = scalar_lea.vmem [#allocation10], %s1298_s23  ;;  %s1329_s1 = int_to_ptr.vmem [resolvable:$true] %s503_s1 }
  0x9a   : > { %v452_v4 = vsub.f32 %v448_v0, %v450_v2  ;;  %v454_v5 = vmul.f32 0.5, %v451_v3  ;;  %s488_s27 = sshll.u32 %s422_s30, 4  ;;  %s1327_s11 = scalar_lea.hbm %s1412_s5, %s711_s24  ;;  %s1336_s27 = int_to_ptr.vmem [resolvable:$true] %s488_s27 }
  0x9b   : > { %s1334_s10 = scalar_lea.hbm %s1411_s4, %s711_s24  ;;  %s473_s13 = scalar_lea.sflag [#allocation12], %s1295_s29 }
  0x9c   : > { %v453_v6 = vmul.f32 %v452_v4, %v449_v1  ;;  %v455_v7 = vadd.f32 1.0, %v454_v5  ;;  %s918_s15 = scalar_lea.vmem %s1329_s1, 128  ;;  %p1444_p8 = scmp.ne.s32.totalorder %s1430_s6, 0 }
  0x9d   : > { %p919_p7 = scmp.ne.s32.totalorder %s1329_s1, %s918_s15  ;;  %s1046_s20 = smov [#allocation11]  }
  0x9e   : > { %v457_v8 = vmul.f32 %v453_v6, %v453_v6  ;;  %v456_v9 = vmul.f32 %v455_v7, %v449_v1  ;;  %s922_s8 = sshll.u32 %s1046_s20, 4  ;;  %s923_s8 = int_to_ptr.vmem [resolvable:$false] %s922_s8 }
  0x9f   : > { %p920_p9 = pnand %p919_p7, %p1444_p8  ;;  %s924_s12 = scalar_lea.vmem %s923_s8, 256 }
  0xa0   : > { %v458_v10 = vmul.f32 %v457_v8, %v456_v9  ;;  %466 = vst [vmem:[%s429_s25] sm:$0xff] %v456_v9  ;;  %p925_p13 = scmp.lt.s32.totalorder %s1329_s1, %s923_s8  ;;  %p926_p11 = scmp.lt.s32.totalorder %s924_s12, %s918_s15 }
  0xa1   : > { %p921_p6 = pneg %p920_p9 }
  0xa2   : > { %p927_p2 = por %p926_p11, %p925_p13 }
  0xa4   : > { %p928_p5 = pnand %p927_p2, %p921_p6 }
  0xa6   : > { %931 = shalt.err (!%p928_p5)
}
  0xa7   : > { %s932_s26 = scalar_lea.hbm %s1327_s11, 128  ;;  %s936_s14 = scalar_lea.hbm %s1412_s5, 256 }
  0xa8   : > { %p933_p0 = scmp.ne.s32.totalorder %s1327_s11, %s932_s26  ;;  %p937_p12 = scmp.lt.u32.totalorder %s1327_s11, %s1412_s5 }
  0xa9   : > { %p938_p10 = scmp.lt.u32.totalorder %s936_s14, %s932_s26  ;;  %p940_p7 = scmp.lt.u32.totalorder %s932_s26, %s1327_s11 }
  0xaa   : > { %p934_p3 = pnand %p933_p0, %p1444_p8 }
  0xab   : > { %p939_p4 = por %p938_p10, %p937_p12 }
  0xac   : > { %p935_p1 = pneg %p934_p3 }
  0xad   : > { %p941_p9 = por %p940_p7, %p939_p4 }
  0xaf   : > { %p942_p6 = pnand %p941_p9, %p935_p1 }
  0xb1   : > { %945 = shalt.err (!%p942_p6)
}
  0xb2   : > { %724 = dma.vmem_to_hbm [thread:$0]  (%p1444_p8), %s1329_s1, 128, %s1327_s11, %s473_s13   ;;  %463 = vst [vmem:[%s422_s30] sm:$0xff] %v458_v10 }
  0xb3   : > { %s468_s25 = scalar_lea.sflag [#allocation4], %s1295_s29  ;;  %s946_s22 = scalar_lea.vmem %s1336_s27, 128 }
  0xb4   : > { %p947_p13 = scmp.ne.s32.totalorder %s1336_s27, %s946_s22  ;;  %s1047_s7 = smov [#allocation10]  }
  0xb5   : > { %s950_s9 = sshll.u32 %s1047_s7, 4  ;;  %s951_s9 = int_to_ptr.vmem [resolvable:$false] %s950_s9 }
  0xb6   : > { %p948_p11 = pnand %p947_p13, %p1444_p8  ;;  %s952_s21 = scalar_lea.vmem %s951_s9, 256 }
  0xb7   : > { %p953_p5 = scmp.lt.s32.totalorder %s1336_s27, %s951_s9  ;;  %p954_p0 = scmp.lt.s32.totalorder %s952_s21, %s946_s22 }
  0xb8   : > { %p949_p2 = pneg %p948_p11 }
  0xb9   : > { %p955_p3 = por %p954_p0, %p953_p5 }
  0xbb   : > { %p956_p1 = pnand %p955_p3, %p949_p2 }
  0xbd   : > { %959 = shalt.err (!%p956_p1)
}
  0xbe   : > { %s960_s29 = scalar_lea.hbm %s1334_s10, 128  ;;  %s964_s30 = scalar_lea.hbm %s1411_s4, 256 }
  0xbf   : > { %p961_p12 = scmp.ne.s32.totalorder %s1334_s10, %s960_s29  ;;  %p965_p7 = scmp.lt.u32.totalorder %s1334_s10, %s1411_s4 }
  0xc0   : > { %p966_p9 = scmp.lt.u32.totalorder %s964_s30, %s960_s29  ;;  %p968_p13 = scmp.lt.u32.totalorder %s960_s29, %s1334_s10 }
  0xc1   : > { %p962_p10 = pnand %p961_p12, %p1444_p8 }
  0xc2   : > { %p967_p6 = por %p966_p9, %p965_p7 }
  0xc3   : > { %p963_p4 = pneg %p962_p10 }
  0xc4   : > { %p969_p11 = por %p968_p13, %p967_p6 }
  0xc6   : > { %p970_p2 = pnand %p969_p11, %p963_p4 }
  0xc8   : > { %973 = shalt.err (!%p970_p2)
}
  0xc9   : > { %723 = dma.vmem_to_hbm [thread:$0]  (%p1444_p8), %s1336_s27, 128, %s1334_s10, %s468_s25  }
  0xca PF: > { %s1445_s15 = sld [smem:[#allocation23_spill]]  ;;  %s1446_s20 = sld [smem:[#allocation20_spill]] }
  0xcb   : > { %s515_s8 = sand.u32 1, %s1020_s18  }
  0xcc   : > { %s516_s12 = scalar_lea.sflag [#allocation4], %s515_s8 }
  0xd0   : > { %p1447_p5 = scmp.ne.s32.totalorder %s1445_s15, 0  ;;  %p1448_p0 = scmp.ge.s32.totalorder %s1446_s20, 2 }
  0xd2   : > { %p741_p3 = pnand %p1448_p0, %p1447_p5 }
  0xd4   : > { %1011 = dma.done.wait (!%p741_p3), %s516_s12, 128  }
  0xd5   : > { %1013 = vsyncadd (!%p741_p3), %s516_s12, 4294967168  ;;  %s525_s26 = scalar_lea.sflag [#allocation12], %s515_s8 }
  0xd6   : > { %1015 = dma.done.wait (!%p741_p3), %s525_s26, 128  }
  0xd7   : > { %1017 = vsyncadd (!%p741_p3), %s525_s26, 4294967168  ;;  %s31_s23 = sadd.s32 1, %s1446_s20   ;;  %s1449_s6 = sld [smem:[#allocation18_spill]] }
  0xd8   : > { %p28_p1 = scmp.ge.s32.totalorder %s31_s23, 4   ;;  %s1450_s20 = sld [smem:[#allocation22_spill]] }
  0xd9   : > { %s1451_s21 = sld [smem:[#allocation19_spill]]  ;;  %s1452_s22 = sld [smem:[#allocation21_spill]] }
  0xda   : > { %s1453_s18 = smov %s1024_s19  ;;  %30 = sbr.rel (!%p28_p1) target bundleno = 14 (0xe), region = 139 }
  0xdd   : > { %s1454_s19 = smov %s1449_s6 }
  0xe1   :  { %530 = vsyncpa [#allocation3], 1 }
  0xe2   :  { %532 = vsyncpa [#allocation3 + $0x1], 1 }
  0xe3   :  { %533 = vsyncpa [#allocation6], 1 }
  0xe4   :  { %535 = vsyncpa [#allocation6 + $0x1], 1 }
  0xe5   :  { %536 = vsyncpa [#allocation9], 1 }
  0xe6   :  { %538 = vsyncpa [#allocation9 + $0x1], 1 }
  0xe7   :  { %539 = vsyncpa [#allocation4], 1 }
  0xe8   :  { %541 = vsyncpa [#allocation4 + $0x1], 1 }
  0xe9   :  { %542 = vsyncpa [#allocation12], 1 }
  0xea   :  { %544 = vsyncpa [#allocation12 + $0x1], 1 }

</bundles_post_ra>
